<compile_context>
chip_gen: v6e
topology: v6e:2x2x1
jax: 0.10.0
libtpu: 0.0.40
codegen_flags: <defaults>
</compile_context>

<pallas_src>
import jax
import jax.numpy as jnp
from jax.experimental import pallas as pl
from jax.experimental.pallas import tpu as pltpu

EMBEDDING_DIM = 100
HIDDEN_DIM = 20
NUM_CLASSES = 12

DEFAULT_TILE_N = 16384          # rows (or columns in "en" layout) per grid step
MIN_SPLIT_N = 2048              # above this, force >=2 tiles so v7x can use both TCs
VMEM_LIMIT_BYTES = 48 * 1024 * 1024


def _round_up(a: int, b: int) -> int:
    return ((a + b - 1) // b) * b


def _hidden_sum_kernel_ne(x_ref, w1_ref, b1_ref, partial_ref):
    """x: (tile_n, E) bf16 | w1: (E, H) bf16 | b1: (1, H) f32 | out: (1, 1, H) f32.

    Per-tile sum(relu(x @ W1 + b1), axis=0).  Padded rows are NOT masked here;
    their exact relu(b1) contribution is removed once in the wrapper epilogue.
    """
    h = jnp.dot(x_ref[...], w1_ref[...], preferred_element_type=jnp.float32)
    h = jnp.maximum(h + b1_ref[...], 0.0)
    partial_ref[...] = jnp.sum(h, axis=0)[None, None, :]


def _hidden_sum_kernel_en(xt_ref, w1t_ref, b1c_ref, partial_ref):
    """xt: (E, tile_n) bf16 | w1t: (H, E) bf16 | b1c: (H, 1) f32 | out: (1, 1, H) f32.

    Transposed orientation: (20,100)@(100,tile_n) keeps the MXU result lane-dense.
    """
    h = jnp.dot(w1t_ref[...], xt_ref[...], preferred_element_type=jnp.float32)
    h = jnp.maximum(h + b1c_ref[...], 0.0)
    partial_ref[...] = jnp.sum(h, axis=1)[None, None, :]


def decoder_forward(x, w1, b1, w2, b2, *, tile_n=DEFAULT_TILE_N,
                    x_layout="ne", cast_to_bf16=True):
    """Decoder forward.  Returns (NUM_CLASSES,) f32.

    x_layout="ne": x is (N, EMBEDDING_DIM)   - the module's natural layout.
    x_layout="en": x is (EMBEDDING_DIM, N)   - use if upstream provides it for free.
    Weights are pre-transposed to (in_features, out_features); biases are (1, out).
    """
    compute_dtype = jnp.bfloat16 if cast_to_bf16 else jnp.float32
    common_params = pltpu.CompilerParams(
        dimension_semantics=("parallel",),   # lets v7x shard tiles across its 2 TCs
        vmem_limit_bytes=VMEM_LIMIT_BYTES,
    )

    if x_layout == "ne":
        n = x.shape[0]
        sub = 16  # bf16 sublane granularity (also covers f32's 8)
        tile_n = max(sub, _round_up(min(tile_n, max(n, 1)), sub))
        if n > MIN_SPLIT_N and _round_up(n, tile_n) // tile_n < 2:
            tile_n = _round_up(-(-n // 2), sub)     # keep >= 2 tiles for 2 TCs
        padded_n = _round_up(n, tile_n)
        if padded_n != n:
            x = jnp.pad(x, ((0, padded_n - n), (0, 0)))
        num_tiles = padded_n // tile_n

        x_k = x.astype(compute_dtype)               # fuses with the pad: one HBM pass
        w1_k = w1.astype(compute_dtype)
        b1_k = b1.astype(jnp.float32)

        partials = pl.pallas_call(
            _hidden_sum_kernel_ne,
            out_shape=jax.ShapeDtypeStruct((num_tiles, 1, HIDDEN_DIM), jnp.float32),
            grid=(num_tiles,),
            in_specs=[
                # Streamed input tile: double-buffered by the Pallas pipeline.
                pl.BlockSpec((tile_n, EMBEDDING_DIM), lambda i: (i, 0)),
                # Weights/bias: constant block index -> resident in VMEM.
                pl.BlockSpec((EMBEDDING_DIM, HIDDEN_DIM), lambda i: (0, 0)),
                pl.BlockSpec((1, HIDDEN_DIM), lambda i: (0, 0)),
            ],
            out_specs=pl.BlockSpec((1, 1, HIDDEN_DIM), lambda i: (i, 0, 0)),
            compiler_params=common_params,
        )(x_k, w1_k, b1_k)

    elif x_layout == "en":
        n = x.shape[1]
        lane = 128
        tile_n = max(lane, _round_up(min(tile_n, max(n, 1)), lane))
        if n > MIN_SPLIT_N and _round_up(n, tile_n) // tile_n < 2:
            tile_n = _round_up(-(-n // 2), lane)
        padded_n = _round_up(n, tile_n)
        if padded_n != n:
            x = jnp.pad(x, ((0, 0), (0, padded_n - n)))
        num_tiles = padded_n // tile_n

        x_k = x.astype(compute_dtype)
        w1t_k = w1.T.astype(compute_dtype)           # (H, E): tiny, one-time
        b1c_k = b1.reshape(HIDDEN_DIM, 1).astype(jnp.float32)

        partials = pl.pallas_call(
            _hidden_sum_kernel_en,
            out_shape=jax.ShapeDtypeStruct((num_tiles, 1, HIDDEN_DIM), jnp.float32),
            grid=(num_tiles,),
            in_specs=[
                pl.BlockSpec((EMBEDDING_DIM, tile_n), lambda i: (0, i)),
                pl.BlockSpec((HIDDEN_DIM, EMBEDDING_DIM), lambda i: (0, 0)),
                pl.BlockSpec((HIDDEN_DIM, 1), lambda i: (0, 0)),
            ],
            out_specs=pl.BlockSpec((1, 1, HIDDEN_DIM), lambda i: (i, 0, 0)),
            compiler_params=common_params,
        )(x_k, w1t_k, b1c_k)

    else:
        raise ValueError(f"unknown x_layout: {x_layout!r}")

    # Epilogue (hoisted, runs once):
    #   mean(relu(xW1+b1)) @ W2 + b2, with the zero-padded rows' exact relu(b1)
    #   contribution removed; padded rows contribute dot(0, W1) + b1 -> relu(b1).
    hidden_sum = jnp.sum(partials[:, 0, :], axis=0)                  # (H,)
    pad_rows = padded_n - n
    if pad_rows:
        hidden_sum = hidden_sum - jnp.float32(pad_rows) * jnp.maximum(
            b1[0].astype(jnp.float32), 0.0)
    denom = jnp.float32(max(n, 1))   # n == 0: mean over empty set is undefined upstream
    hidden_mean = hidden_sum / denom
    out = hidden_mean @ w2.astype(jnp.float32) + b2[0].astype(jnp.float32)
    return out                                                        # (NUM_CLASSES,)


def init_params(key):
    """Deterministic parameter init (uniform, torch-Linear-like fan_in bound)."""
    k1, k2, k3, k4 = jax.random.split(key, 4)
    bound1 = 1.0 / jnp.sqrt(EMBEDDING_DIM)
    bound2 = 1.0 / jnp.sqrt(HIDDEN_DIM)
    # Stored already transposed to (in, out) for the kernel.
    w1 = jax.random.uniform(k1, (EMBEDDING_DIM, HIDDEN_DIM), jnp.float32,
                            minval=-bound1, maxval=bound1)
    b1 = jax.random.uniform(k2, (1, HIDDEN_DIM), jnp.float32,
                            minval=-bound1, maxval=bound1)
    w2 = jax.random.uniform(k3, (HIDDEN_DIM, NUM_CLASSES), jnp.float32,
                            minval=-bound2, maxval=bound2)
    b2 = jax.random.uniform(k4, (1, NUM_CLASSES), jnp.float32,
                            minval=-bound2, maxval=bound2)
    return w1, b1, w2, b2


def reference_forward(x, w1, b1, w2, b2, *, cast_to_bf16=True):
    """Pure-JAX reference of the same semantics (for correctness checks)."""
    dt = jnp.bfloat16 if cast_to_bf16 else x.dtype
    h = jnp.maximum(
        jnp.dot(x.astype(dt), w1.astype(dt), preferred_element_type=jnp.float32)
        + b1.astype(jnp.float32),
        0.0)
    y = h @ w2 + b2
    return jnp.mean(y, axis=0)


if __name__ == "__main__":
    key = jax.random.PRNGKey(0)
    kx, kx2, kp = jax.random.split(key, 3)
    w1, b1, w2, b2 = init_params(kp)

    # Small demo consistent with the module: N samples of 100-d embeddings.
    N = 8
    x = jax.random.normal(kx, (N, EMBEDDING_DIM), jnp.float32)
    out = jax.block_until_ready(decoder_forward(x, w1, b1, w2, b2))
    ref_bf16 = reference_forward(x, w1, b1, w2, b2, cast_to_bf16=True)
    ref_f32 = reference_forward(x, w1, b1, w2, b2, cast_to_bf16=False)
    assert out.shape == (NUM_CLASSES,)
    assert jnp.allclose(out, ref_bf16, atol=5e-3, rtol=5e-3), (out, ref_bf16)
    assert jnp.allclose(out, ref_f32, atol=3e-2, rtol=3e-2), (out, ref_f32)

    # Multi-tile grid + padded-row correction path ("ne" layout).
    N2 = 300
    x2 = jax.random.normal(kx2, (N2, EMBEDDING_DIM), jnp.float32)
    out2 = jax.block_until_ready(decoder_forward(x2, w1, b1, w2, b2, tile_n=128))
    ref2 = reference_forward(x2, w1, b1, w2, b2, cast_to_bf16=True)
    assert out2.shape == (NUM_CLASSES,)
    assert jnp.allclose(out2, ref2, atol=5e-3, rtol=5e-3), (out2, ref2)

    # Transposed "en" layout (as if the upstream handed x over as (E, N)).
    out3 = jax.block_until_ready(
        decoder_forward(x2.T, w1, b1, w2, b2, tile_n=128, x_layout="en"))
    assert out3.shape == (NUM_CLASSES,)
    assert jnp.allclose(out3, ref2, atol=5e-3, rtol=5e-3), (out3, ref2)

    print("KERNEL_OK")
</pallas_src>

<mosaic_0001>
module attributes {stable_mosaic.version = 11 : i64} {
  func.func @_hidden_sum_kernel_ne(%arg0: i32, %arg1: memref<16x100xbf16, #tpu.memory_space<vmem>>, %arg2: memref<100x20xbf16, #tpu.memory_space<vmem>>, %arg3: memref<1x20xf32, #tpu.memory_space<vmem>>, %arg4: memref<1x1x20xf32, #tpu.memory_space<vmem>>) attributes {dimension_semantics = [#tpu.dimension_semantics<parallel>], iteration_bounds = array<i64: 1>, scalar_prefetch = 0 : i64, scratch_operands = 0 : i64, tpu.core_type = #tpu.core_type<tc>, window_params = [{transform_indices = @transform_0, window_bounds = array<i64: 16, 100>}, {pipeline_mode = #tpu.pipeline_mode<synchronous>, transform_indices = @transform_1, window_bounds = array<i64: 100, 20>}, {pipeline_mode = #tpu.pipeline_mode<synchronous>, transform_indices = @transform_2, window_bounds = array<i64: 1, 20>}, {transform_indices = @transform_3, window_bounds = array<i64: 1, 1, 20>}]} {
    %c0 = arith.constant 0 : index
    %c0_0 = arith.constant 0 : index
    %0 = vector.load %arg1[%c0, %c0_0] : memref<16x100xbf16, #tpu.memory_space<vmem>>, vector<16x100xbf16>
    %c0_1 = arith.constant 0 : index
    %c0_2 = arith.constant 0 : index
    %1 = vector.load %arg2[%c0_1, %c0_2] : memref<100x20xbf16, #tpu.memory_space<vmem>>, vector<100x20xbf16>
    %cst = arith.constant dense<0.000000e+00> : vector<16x20xf32>
    %2 = tpu.matmul %0, %1, %cst {dimension_numbers = #tpu.dot_dimension_numbers<[1], [0], [0], [1], [0, 0, 1, 1], [], []>} : vector<16x100xbf16>, vector<100x20xbf16>, vector<16x20xf32> -> vector<16x20xf32>
    %c0_3 = arith.constant 0 : index
    %c0_4 = arith.constant 0 : index
    %3 = vector.load %arg3[%c0_3, %c0_4] : memref<1x20xf32, #tpu.memory_space<vmem>>, vector<1x20xf32>
    %4 = vector.broadcast %3 : vector<1x20xf32> to vector<16x20xf32>
    %5 = arith.addf %2, %4 : vector<16x20xf32>
    %cst_5 = arith.constant 0.000000e+00 : f32
    %6 = vector.broadcast %cst_5 : f32 to vector<16x20xf32>
    %7 = arith.maximumf %5, %6 : vector<16x20xf32>
    %cst_6 = arith.constant dense<0.000000e+00> : vector<20xf32>
    %8 = vector.multi_reduction <add>, %7, %cst_6 [0] : vector<16x20xf32> to vector<20xf32>
    %9 = vector.shape_cast %8 : vector<20xf32> to vector<1x1x20xf32>
    %c0_7 = arith.constant 0 : index
    %c0_8 = arith.constant 0 : index
    %c0_9 = arith.constant 0 : index
    %10 = vector.load %arg4[%c0_7, %c0_8, %c0_9] : memref<1x1x20xf32, #tpu.memory_space<vmem>>, vector<1x1x20xf32>
    tpu.vector_store %arg4[%c0_7, %c0_8, %c0_9], %9 {strides = array<i32>} : memref<1x1x20xf32, #tpu.memory_space<vmem>>, vector<1x1x20xf32>,
    return
  }
  func.func @transform_0(%arg0: i32) -> (i32, i32) {
    %c0_i32 = arith.constant 0 : i32
    %c0_i32_0 = arith.constant 0 : i32
    return %arg0, %c0_i32 : i32, i32
  }
  func.func @transform_1(%arg0: i32) -> (i32, i32) {
    %c0_i32 = arith.constant 0 : i32
    %c0_i32_0 = arith.constant 0 : i32
    %c0_i32_1 = arith.constant 0 : i32
    return %c0_i32, %c0_i32_0 : i32, i32
  }
  func.func @transform_2(%arg0: i32) -> (i32, i32) {
    %c0_i32 = arith.constant 0 : i32
    %c0_i32_0 = arith.constant 0 : i32
    %c0_i32_1 = arith.constant 0 : i32
    return %c0_i32, %c0_i32_0 : i32, i32
  }
  func.func @transform_3(%arg0: i32) -> (i32, i32, i32) {
    %c0_i32 = arith.constant 0 : i32
    %c0_i32_0 = arith.constant 0 : i32
    %c0_i32_1 = arith.constant 0 : i32
    return %arg0, %c0_i32, %c0_i32_0 : i32, i32, i32
  }
}

</mosaic_0001>

<bundles_post_ra>
// kernel: tpu_custom_call.1
= control target key start
LH: loop header
LB: loop body
LE: loop exit
PB: predicated region body
PF: predicated region fallthrough
CT: control target
= control target key end

     0   :  { %v228_v1 = vmov 0.0   ;;  %vm86_vm0 = vcmask 1041408   ;;  %vm229_vm1 = vmmov 0   ;;  %s281_s0 = inlined_call_operand.vmem [shape: bf16[16,100], index: 0, kind: input, shape index: {}]   ;;  %s282_s1 = inlined_call_operand.vmem [shape: bf16[100,20], index: 1, kind: input, shape index: {}]   ;;  %s283_s2 = inlined_call_operand.vmem [shape: f32[1,20], index: 2, kind: input, shape index: {}]   ;;  %s284_s3 = inlined_call_operand.hbm [shape: f32[1,1,20], index: 3, kind: output, shape index: {}]  }
   0x1   :  { %v198_v0 = vld [vmem:[%s282_s1 + $0x30] ss:$0 sps:$4 sm:$0x33]   ;;  %177 = vmatprep.subr.bf16.mxu0 %v228_v1  ;;  %v199_v3 = vld [vmem:[%s282_s1 + $0x28] sm:$0xff]   ;;  %191 = vmatprep.mubr.msk.bf16.mxu0 %vm229_vm1, %v228_v1  ;;  %v200_v4 = vld [vmem:[%s282_s1 + $0x20] sm:$0xff]  }
   0x2   :  { %v88_v2 = vsel %vm86_vm0, %v198_v0, 0 }
   0x3   :  { %178 = vmatpush3.bf16.msra.mxu0 %v88_v2 }
   0x4   :  { %179 = vmatprep.subr.bf16.mxu0 %v228_v1 }
   0x7   :  { %180 = vmatpush3.bf16.msra.mxu0 %v199_v3 }
   0x8   :  { %181 = vmatprep.subr.bf16.mxu0 %v228_v1 }
   0x9   :  { %8 = vsyncpa [#allocation3], 0  ;;  %v201_v5 = vld [vmem:[%s282_s1 + $0x18] sm:$0xff]   ;;  %v202_v6 = vld [vmem:[%s282_s1 + $0x10] sm:$0xff]   ;;  %vm82_vm2 = vcmask 818176   ;;  %vm133_vm3 = vcmask 162816  }
   0xa   :  { %v203_v7 = vld [vmem:[%s282_s1 + $0x8] sm:$0xff]   ;;  %v204_v8 = vld [vmem:[%s282_s1] sm:$0xff]   ;;  %vm143_vm4 = vcmask 155648  }
   0xb   :  { %182 = vmatpush3.bf16.msra.mxu0 %v200_v4  ;;  %v205_v9 = vld [vmem:[%s281_s0] sm:$0xff]   ;;  %s230_s0 = smov [#allocation2]  }
   0xc   :  { %183 = vmatprep.subr.bf16.mxu0 %v228_v1  ;;  %v159_v10 = vld [vmem:[%s283_s2] ss:$0 sm:$0xff]  ;;  %s151_s1 = sshll.u32 %s230_s0, 4  ;;  %s152_s1 = int_to_ptr.vmem [resolvable:$true] %s151_s1 }
   0xd   :  { %s206_s2 = scalar_lea.vmem %s152_s1, 16  ;;  %s210_s30 = scalar_lea.vmem %s152_s1, 32 }
   0xe   :  { %p207_p0 = scmp.ne.s32.totalorder %s152_s1, %s206_s2  ;;  %p211_p1 = scmp.lt.s32.totalorder %s152_s1, %s152_s1 }
   0xf   :  { %184 = vmatpush3.bf16.msra.mxu0 %v201_v5  ;;  %p212_p2 = scmp.lt.s32.totalorder %s210_s30, %s206_s2 }
  0x10   :  { %185 = vmatprep.subr.bf16.mxu0 %v228_v1 }
  0x11   :  { %p213_p3 = por %p212_p2, %p211_p1 }
  0x13   :  { %186 = vmatpush3.bf16.msra.mxu0 %v202_v6  ;;  %p214_p4 = pnand %p213_p3, %p207_p0 }
  0x14   :  { %187 = vmatprep.subr.bf16.mxu0 %v228_v1 }
  0x17   :  { %188 = vmatpush3.bf16.msra.mxu0 %v203_v7 }
  0x18   :  { %189 = vmatprep.subr.bf16.mxu0 %v228_v1 }
  0x1b   :  { %190 = vmatpush3.bf16.msra.mxu0 %v204_v8 }
  0x1e   :  { %192 = vmatmul.mubr.msk.bf16.vlgmr.msra.gmra.mxu0 %vm82_vm2, %v205_v9 }
  0xde   :  { %v124_v11 = vpop.f32.mrf.mxu0 }
  0xdf   :  { %v125_v12 = vadd.f32 %v159_v10, %v124_v11 }
  0xe0   :  { %v193_v13 = vpop.f32.mrf.mxu0 }
  0xe1   :  { %v131_v15 = vmax.f32 %v125_v12, 0.0 }
  0xe2   :  { %v127_v14 = vpop.f32.mrf.mxu0 }
  0xe3   :  { %v128_v16 = vadd.f32 %v159_v10, %v127_v14  ;;  %v134_v19 = vsel %vm133_vm3, %v131_v15, 0.0 }
  0xe4   :  { %v194_v17 = vpop.f32.mrf.mxu0 }
  0xe5   :  { %v132_v18 = vmax.f32 %v128_v16, 0.0 }
  0xe7   :  { %v135_v20 = vsel %vm133_vm3, %v132_v18, 0.0 }
  0xe8   :  { %v136_v21 = vadd.f32 %v135_v20, %v134_v19 }
  0xea   :  { %v137_v22 = vrot.slane %v136_v21, 4 }
  0xec   :  { %v138_v23 = vadd.f32 %v137_v22, %v136_v21 }
  0xee   :  { %v139_v24 = vrot.slane %v138_v23, 2 }
  0xf0   :  { %v140_v25 = vadd.f32 %v139_v24, %v138_v23 }
  0xf2   :  { %v141_v26 = vrot.slane %v140_v25, 1 }
  0xf4   :  { %v142_v27 = vadd.f32 %v141_v26, %v140_v25 }
  0xf6   :  { %144 = vst.msk [vmem:[#allocation2] sm:$0x1] %vm143_vm4, %v142_v27 }
  0xf7   :  { %217 = shalt.err (!%p214_p4)
}
  0xf8   :  { %154 = dma.vmem_to_hbm [thread:$0]  %s152_s1, 16, %s284_s3, [#allocation3]  }
  0xf9   :  { %226 = dma.done.wait [#allocation3], 16  }
  0xfa   :  { %227 = vsyncadd [#allocation3], 4294967280 }
  0xfb   :  { %158 = vsyncpa [#allocation3], 1 }

</bundles_post_ra>
